<compile_context>
chip_gen: v7x
topology: tpu7x:2x2x1
jax: 0.10.0
libtpu: 0.0.40
codegen_flags: <defaults>
</compile_context>

<pallas_src>
import jax
import jax.numpy as jnp
from jax.experimental import pallas as pl
from jax.experimental.pallas import tpu as pltpu

_LANE = 128
_SUBLANE = 8
_ROW_TILE = _LANE * _SUBLANE            # 1024: keeps every block dim (8,128)-aligned
_SMALL_BATCH_MAX = 1024                 # below this, skip the grid entirely
_X_BLOCK_VMEM_BYTES = 8 * 1024 * 1024   # target VMEM bytes per (double-buffered) x block
_VMEM_LIMIT_BYTES = 48 * 1024 * 1024    # > v5e/v6e scoped defaults, < v7x 64 MiB physical


def _linear_kernel(x_ref, w_ref, b_ref, o_ref):
    """One tile of y = x @ w^T + b.

    x_ref: (TB, D) VMEM   w_ref: (1, D) VMEM   b_ref: (1, 1) SMEM
    o_ref: (TB//128, 128) VMEM (lane-dense grid path) or (TB, 1) / (B, 1) VMEM.
    """
    prod = x_ref[...] * w_ref[...]                 # VPU multiply, broadcast over rows
    acc = jnp.sum(prod, axis=-1, keepdims=True)    # XLU lane reduce -> (TB, 1) f32
    acc = acc + b_ref[0, 0]
    if acc.shape != o_ref.shape:                   # lane-dense store path
        acc = acc.reshape(o_ref.shape)             # (TB,1)->(TB//128,128) relayout
    o_ref[...] = acc.astype(o_ref.dtype)


def _single_block_forward(x, w_row, b_smem):
    """Tiny-batch fast path: whole problem in one VMEM block, no grid/pipeline."""
    batch, _ = x.shape
    return pl.pallas_call(
        _linear_kernel,
        out_shape=jax.ShapeDtypeStruct((batch, 1), jnp.float32),
        in_specs=[
            pl.BlockSpec(memory_space=pltpu.MemorySpace.VMEM),
            pl.BlockSpec(memory_space=pltpu.MemorySpace.VMEM),
            pl.BlockSpec(memory_space=pltpu.MemorySpace.SMEM),
        ],
        out_specs=pl.BlockSpec(memory_space=pltpu.MemorySpace.VMEM),
    )(x, w_row, b_smem)


def _grid_forward(x_pad, w_row, b_smem, tb, lane_dense):
    """Batch-tiled path over a padded (B_pad, D) input; returns (B_pad, 1)."""
    b_pad, d = x_pad.shape
    grid = (b_pad // tb,)
    in_specs = [
        pl.BlockSpec((tb, d), lambda i: (i, 0)),
        pl.BlockSpec((1, d), lambda i: (0, 0)),          # resident: constant block idx
        pl.BlockSpec(memory_space=pltpu.MemorySpace.SMEM),
    ]
    if lane_dense:
        out_shape = jax.ShapeDtypeStruct((b_pad // _LANE, _LANE), jnp.float32)
        out_specs = pl.BlockSpec((tb // _LANE, _LANE), lambda i: (i, 0))
    else:
        out_shape = jax.ShapeDtypeStruct((b_pad, 1), jnp.float32)
        out_specs = pl.BlockSpec((tb, 1), lambda i: (i, 0))
    out = pl.pallas_call(
        _linear_kernel,
        out_shape=out_shape,
        grid=grid,
        in_specs=in_specs,
        out_specs=out_specs,
        compiler_params=pltpu.CompilerParams(
            dimension_semantics=("parallel",),
            vmem_limit_bytes=_VMEM_LIMIT_BYTES,
        ),
    )(x_pad, w_row, b_smem)
    return out.reshape(b_pad, 1)


def _choose_batch_tile(batch, d):
    # VMEM rows are lane-padded to a multiple of 128 f32 lanes; budget on that.
    padded_row_bytes = pl.cdiv(d, _LANE) * _LANE * 4
    rows = _X_BLOCK_VMEM_BYTES // padded_row_bytes
    rows = max(_ROW_TILE, (rows // _ROW_TILE) * _ROW_TILE)
    # Cap so the grid has >= 2 programs: lets the "parallel" batch axis shard
    # across v7x's two TensorCores (harmless no-op on v5e/v6e).
    half = pl.cdiv(pl.cdiv(batch, 2), _ROW_TILE) * _ROW_TILE
    return min(rows, half)


def linear_regression_forward(x, weight, bias, *, batch_tile=None):
    """Forward of nn.Linear(input_dim, 1): x @ weight^T + bias.

    x: (B, D) float; weight: (1, D); bias: (1,). Returns (B, 1) float32.
    """
    batch, d = x.shape
    x = x.astype(jnp.float32)
    w_row = weight.reshape(1, d).astype(jnp.float32)     # lane-dense weight, no transpose
    b_smem = bias.reshape(1, 1).astype(jnp.float32)      # scalar bias -> SMEM

    if batch <= _SMALL_BATCH_MAX:
        return _single_block_forward(x, w_row, b_smem)

    tb = batch_tile if batch_tile is not None else _choose_batch_tile(batch, d)
    tb = max(_ROW_TILE, (tb // _ROW_TILE) * _ROW_TILE)
    n_tiles = pl.cdiv(batch, tb)
    batch_pad = n_tiles * tb
    if batch_pad != batch:
        # TODO(synk): a masked partial last tile would avoid this extra HBM copy of x.
        x = jnp.pad(x, ((0, batch_pad - batch), (0, 0)))

    try:
        out = _grid_forward(x, w_row, b_smem, tb, lane_dense=True)
    except Exception:
        # Mosaic build without the (TB,1)->(TB//128,128) relayout: keep the
        # same tiling but store (TB,1) blocks (masked stores, still correct).
        out = _grid_forward(x, w_row, b_smem, tb, lane_dense=False)
    return out[:batch]


if __name__ == "__main__":
    key = jax.random.PRNGKey(0)
    k_x, k_w, k_b, k_xl = jax.random.split(key, 4)

    input_dim = 32  # stands in for the one-hot encoded feature width
    # nn.Linear(input_dim, 1): weight (1, input_dim), bias (1,)
    w = jax.random.normal(k_w, (1, input_dim), dtype=jnp.float32) * 0.1
    b = jax.random.normal(k_b, (1,), dtype=jnp.float32) * 0.1

    # 1) Tiny batch -> single-block fast path.
    x = jax.random.normal(k_x, (8, input_dim), dtype=jnp.float32)
    out = jax.block_until_ready(linear_regression_forward(x, w, b))
    ref = x @ w.T + b
    assert out.shape == (8, 1)
    assert jnp.allclose(out, ref, atol=1e-4, rtol=1e-4), "small-path mismatch"

    # 2) Larger, non-multiple-of-tile batch -> cdiv grid path (>= 2 "parallel"
    #    programs, wrapper-side padding, lane-dense output). Kept small/fast.
    big_batch = 3000
    xl = jax.random.normal(k_xl, (big_batch, input_dim), dtype=jnp.float32)
    outl = jax.block_until_ready(linear_regression_forward(xl, w, b))
    refl = xl @ w.T + b
    assert outl.shape == (big_batch, 1)
    assert jnp.allclose(outl, refl, atol=1e-4, rtol=1e-4), "grid-path mismatch"

    print("KERNEL_OK")
</pallas_src>

<mosaic_0001>
module attributes {stable_mosaic.version = 11 : i64} {
  func.func @_linear_kernel(%arg0: memref<8x32xf32, #tpu.memory_space<vmem>>, %arg1: memref<1x32xf32, #tpu.memory_space<vmem>>, %arg2: memref<1x1xf32, #tpu.memory_space<smem>>, %arg3: memref<8x1xf32, #tpu.memory_space<vmem>>) attributes {dimension_semantics = [], scalar_prefetch = 0 : i64, scratch_operands = 0 : i64, tpu.core_type = #tpu.core_type<tc>} {
    %c0 = arith.constant 0 : index
    %c0_0 = arith.constant 0 : index
    %0 = vector.load %arg0[%c0, %c0_0] : memref<8x32xf32, #tpu.memory_space<vmem>>, vector<8x32xf32>
    %c0_1 = arith.constant 0 : index
    %c0_2 = arith.constant 0 : index
    %1 = vector.load %arg1[%c0_1, %c0_2] : memref<1x32xf32, #tpu.memory_space<vmem>>, vector<1x32xf32>
    %2 = vector.broadcast %1 : vector<1x32xf32> to vector<8x32xf32>
    %3 = arith.mulf %0, %2 : vector<8x32xf32>
    %cst = arith.constant dense<0.000000e+00> : vector<8xf32>
    %4 = vector.multi_reduction <add>, %3, %cst [1] : vector<8x32xf32> to vector<8xf32>
    %5 = vector.shape_cast %4 : vector<8xf32> to vector<8x1xf32>
    %c0_3 = arith.constant 0 : index
    %c0_4 = arith.constant 0 : index
    %6 = memref.load %arg2[%c0_3, %c0_4] : memref<1x1xf32, #tpu.memory_space<smem>>
    %7 = vector.broadcast %6 : f32 to vector<8x1xf32>
    %8 = arith.addf %5, %7 : vector<8x1xf32>
    %c0_5 = arith.constant 0 : index
    %c0_6 = arith.constant 0 : index
    %9 = vector.load %arg3[%c0_5, %c0_6] : memref<8x1xf32, #tpu.memory_space<vmem>>, vector<8x1xf32>
    tpu.vector_store %arg3[%c0_5, %c0_6], %8 {strides = array<i32>} : memref<8x1xf32, #tpu.memory_space<vmem>>, vector<8x1xf32>,
    return
  }
}

</mosaic_0001>

<bundles_post_ra>
// kernel: tpu_custom_call.1
= control target key start
LH: loop header
LB: loop body
LE: loop exit
PB: predicated region body
PF: predicated region fallthrough
CT: control target
= control target key end

     0   :  { %9 = vsyncpa [#allocation4], 0  ;;  %s76_s12 = smov [#allocation3]   ;;  %s118_s0 = inlined_call_operand.hbm [shape: f32[8,32], index: 0, kind: input, shape index: {}]   ;;  %s119_s1 = inlined_call_operand.vmem [shape: f32[1,32], index: 1, kind: input, shape index: {}]   ;;  %s120_s2 = inlined_call_operand.<no memory space> [shape: f32[1,1], index: 2, kind: input, shape index: {}]   ;;  %s121_s3 = inlined_call_operand.vmem [shape: f32[8,1], index: 3, kind: output, shape index: {}]  }
   0x1   :  { %s16_s13 = sshll.u32 %s76_s12, 4  ;;  %s52_s16 = scalar_lea.hbm %s118_s0, 128  ;;  %s17_s13 = int_to_ptr.vmem [resolvable:$true] %s16_s13 }
   0x2   :  { %p53_p0 = scmp.ne.s32.totalorder %s118_s0, %s52_s16  ;;  %p56_p1 = scmp.lt.u32.totalorder %s52_s16, %s118_s0 }
   0x4   :  { %p58_p2 = pnand %p56_p1, %p53_p0 }
   0x6   :  { %61 = shalt.err (!%p58_p2)
}
   0x7   :  { %s62_s21 = scalar_lea.vmem %s17_s13, 128  ;;  %p67_p4 = scmp.lt.s32.totalorder %s17_s13, %s17_s13 }
   0x8   :  { %p63_p3 = scmp.ne.s32.totalorder %s17_s13, %s62_s21  ;;  %p68_p5 = scmp.lt.s32.totalorder %s62_s21, %s62_s21 }
   0xa   :  { %p69_p6 = por %p68_p5, %p67_p4 }
   0xc   :  { %p70_p7 = pnand %p69_p6, %p63_p3 }
   0xe   :  { %73 = shalt.err (!%p70_p7)
}
   0xf   :  { %19 = dma.hbm_to_vmem [thread:$0]  %s118_s0, 128, %s17_s13, [#allocation4]  }
  0x10   :  { %74 = dma.done.wait [#allocation4], 128  }
  0x11   :  { %75 = vsyncadd [#allocation4], 4294967168  ;;  %v27_v0 = vld [vmem:[#allocation3] sm:$0xff]  ;;  %vm36_vm0 = vcmask 261120   ;;  %v41_v4 = vstv %s120_s2  ;;  %vm43_vm1 = vcmask 7168  }
  0x12   :  { %v50_v1 = vld [vmem:[%s119_s1] ss:$0 sm:$0xff] }
  0x13   :  { %v35_v2 = vmul.f32 %v50_v1, %v27_v0 }
  0x15   :  { %v37_v3 = vsel %vm36_vm0, %v35_v2, 0.0 }
  0x16   :  { %38 = vadd.xlane.f32.xlu0 %v37_v3 }
  0xa3   :  { %v39_v5 = vpop.xlane.xlu0 %38 }
  0xa4   :  { %v42_v6 = vadd.f32 %v41_v4, %v39_v5 }
  0xa6   :  { %44 = vst.msk [vmem:[%s121_s3] sm:$0xff] %vm43_vm1, %v42_v6 }
  0xa7   :  { %49 = vsyncpa [#allocation4], 1 }

</bundles_post_ra>
